<compile_context>
chip_gen: v7x
topology: tpu7x:2x2x1
jax: 0.10.0
libtpu: 0.0.40
codegen_flags: <defaults>
</compile_context>

<pallas_src>
import functools

import jax
import jax.numpy as jnp
from jax.experimental import pallas as pl
from jax.experimental.pallas import tpu as pltpu

_HAAR_LO = 0.7071067811865476          # pywt.Wavelet('haar').rec_lo entry
_HAAR_SCALE = _HAAR_LO * _HAAR_LO      # row-pass * col-pass low-pass gain (= 0.5)


# --------------------------------------------------------------------------
# Kernel
# --------------------------------------------------------------------------
def _dwt_alterchan_kernel(xs_ref, w_ref, o_ref, *, use_mxu):
    """Fused Haar-LL window sum + 1x1 conv for one pixel tile.

    xs_ref: (4, Cin, tp)  -- the four 2x2 window-position slabs
    w_ref : (Cout, Cin)   -- 1x1 conv weight pre-scaled by the Haar LL gain
    o_ref : (Cout, tp)
    """
    # Window sum (Haar LL up to the folded 0.5 gain), always in f32.
    s = (xs_ref[0].astype(jnp.float32) + xs_ref[1].astype(jnp.float32)
         + xs_ref[2].astype(jnp.float32) + xs_ref[3].astype(jnp.float32))
    w = w_ref[...].astype(jnp.float32)            # (Cout, Cin), tiny

    if use_mxu:
        # Single MXU contraction over Cin (K already padded by hardware).
        o_ref[...] = jnp.dot(w, s,
                             preferred_element_type=jnp.float32
                             ).astype(o_ref.dtype)
    else:
        # Small-channel path: unrolled VPU outer-product accumulation
        #   out = sum_ci  w[:, ci] (x) s[ci, :]
        cin = s.shape[0]
        acc = w[:, 0:1] * s[0:1, :]
        for ci in range(1, cin):
            acc = acc + w[:, ci:ci + 1] * s[ci:ci + 1, :]
        o_ref[...] = acc.astype(o_ref.dtype)


# --------------------------------------------------------------------------
# Wrapper
# --------------------------------------------------------------------------
def _round_up(v, m):
    return (v + m - 1) // m * m


def _pick_tile_p(P, cin, cout, requested, vmem_budget_bytes):
    """Pick the pixel-axis tile so double-buffered streams fit the VMEM budget."""
    p_aligned = _round_up(max(P, 1), 128)
    # double-buffered stacked input (4*Cin rows) + double-buffered output, f32
    bytes_per_p = (2 * 4 * cin + 2 * cout) * 4
    cap = max(128, (vmem_budget_bytes // bytes_per_p) // 128 * 128)
    tp = min(_round_up(requested, 128), cap, p_aligned)
    # Prefer >= 2 grid steps when there is enough work: enables pipelining and
    # lets the "parallel" axis shard across v7x's two TensorCores.
    if p_aligned >= 1024 and tp >= p_aligned:
        tp = min(p_aligned, _round_up(pl.cdiv(p_aligned, 2), 128))
    return tp


def dwt_pooling_alter_chan(x, weight, *, tile_p=8192,
                           small_c_threshold=16,
                           vmem_budget_bytes=24 << 20,
                           vmem_limit_bytes=40 << 20):
    """Haar-DWT LL pooling followed by a 1x1 conv (no bias).

    x:      (N, Cin, H, W) float
    weight: (Cout, Cin, 1, 1) or (Cout, Cin)
    returns (N, Cout, H//2, W//2) float32
    """
    if weight.ndim == 4:
        weight = weight[:, :, 0, 0]
    cout, cin = weight.shape

    x = x.astype(jnp.float32)
    N, C, H, W = x.shape
    assert C == cin, (C, cin)
    Ho, Wo = H // 2, W // 2
    P = N * Ho * Wo

    # ---- layout glue: ONE fused XLA transpose producing the stacked slabs ----
    # (N, C, Ho, 2, Wo, 2) -> (kh, kw, C, N, Ho, Wo) -> (4, C, P)
    # slab k = 2*kh + kw covers window position (kh, kw) == x[:, :, kh::2, kw::2]
    xw = x[:, :, :2 * Ho, :2 * Wo].reshape(N, C, Ho, 2, Wo, 2)
    xs = jnp.transpose(xw, (3, 5, 1, 0, 2, 4)).reshape(4, C, P)

    tp = _pick_tile_p(P, cin, cout, tile_p, vmem_budget_bytes)
    P_pad = pl.cdiv(P, tp) * tp
    if P_pad != P:
        xs = jnp.pad(xs, ((0, 0), (0, 0), (0, P_pad - P)))

    # Fold the Haar LL gain (0.5) into the tiny 1x1-conv weight.
    w_half = _HAAR_SCALE * weight.astype(jnp.float32)

    use_mxu = cin > small_c_threshold
    kernel = functools.partial(_dwt_alterchan_kernel, use_mxu=use_mxu)

    out = pl.pallas_call(
        kernel,
        out_shape=jax.ShapeDtypeStruct((cout, P_pad), jnp.float32),
        grid_spec=pltpu.PrefetchScalarGridSpec(
            num_scalar_prefetch=0,
            grid=(P_pad // tp,),
            in_specs=[pl.BlockSpec((4, cin, tp), lambda i: (0, 0, i)),
                      pl.BlockSpec((cout, cin), lambda i: (0, 0))],
            out_specs=pl.BlockSpec((cout, tp), lambda i: (0, i)),
        ),
        compiler_params=pltpu.CompilerParams(
            dimension_semantics=("parallel",),
            vmem_limit_bytes=vmem_limit_bytes),
    )(xs, w_half)

    out = out[:, :P].reshape(cout, N, Ho, Wo)
    return jnp.transpose(out, (1, 0, 2, 3))            # back to NCHW


# --------------------------------------------------------------------------
# Reference + init (for the self-test)
# --------------------------------------------------------------------------
def _reference(x, weight):
    """Pure-JAX reference: Haar LL (M_L x M_L^T) then 1x1 conv, f32 exact."""
    x = x.astype(jnp.float32)
    N, C, H, W = x.shape
    Ho, Wo = H // 2, W // 2
    xc = x[:, :, :2 * Ho, :2 * Wo]
    ll = _HAAR_SCALE * (xc[:, :, 0::2, 0::2] + xc[:, :, 0::2, 1::2]
                        + xc[:, :, 1::2, 0::2] + xc[:, :, 1::2, 1::2])
    w2d = weight.reshape(weight.shape[0], weight.shape[1]).astype(jnp.float32)
    return jnp.einsum('oi,nihw->nohw', w2d, ll,
                      precision=jax.lax.Precision.HIGHEST)


def init_conv1x1(key, in_channels, out_channels):
    """Deterministic Conv2d(in, out, 1, bias=False) weight (PyTorch-style uniform)."""
    bound = 1.0 / (in_channels ** 0.5)          # fan_in = in_channels * 1 * 1
    return jax.random.uniform(key, (out_channels, in_channels, 1, 1),
                              minval=-bound, maxval=bound, dtype=jnp.float32)


# TODO(synk): only the 'haar' wavelet (the one the module hard-codes) is
# implemented; general pywt wavelets (band_length > 2) are not translated.

if __name__ == "__main__":
    key = jax.random.PRNGKey(0)
    k_x, k_w, k_x2, k_w2, k_x3, k_w3 = jax.random.split(key, 6)

    # ---- small case (exercises the VPU small-channel conv path) ----
    N, Cin, Cout, H, W = 2, 4, 8, 16, 16
    x = jax.random.normal(k_x, (N, Cin, H, W), dtype=jnp.float32)
    weight = init_conv1x1(k_w, Cin, Cout)

    out = jax.block_until_ready(jax.jit(dwt_pooling_alter_chan)(x, weight))
    assert out.shape == (N, Cout, H // 2, W // 2), out.shape
    assert jnp.all(jnp.isfinite(out))
    ref = _reference(x, weight)
    assert jnp.allclose(out, ref, rtol=1e-5, atol=1e-5), \
        float(jnp.max(jnp.abs(out - ref)))

    # ---- larger-channel case (exercises the MXU path) ----
    N2, C2, H2, W2 = 2, 32, 16, 16
    x2 = jax.random.normal(k_x2, (N2, C2, H2, W2), dtype=jnp.float32)
    w2 = init_conv1x1(k_w2, C2, C2)
    out2 = jax.block_until_ready(jax.jit(dwt_pooling_alter_chan)(x2, w2))
    ref2 = _reference(x2, w2)
    assert out2.shape == (N2, C2, H2 // 2, W2 // 2), out2.shape
    assert jnp.allclose(out2, ref2, rtol=1e-2, atol=1e-2), \
        float(jnp.max(jnp.abs(out2 - ref2)))

    # ---- odd spatial dims (last row/col dropped, exercises padding + crop) ----
    N3, C3, H3, W3, Co3 = 2, 4, 15, 15, 8
    x3 = jax.random.normal(k_x3, (N3, C3, H3, W3), dtype=jnp.float32)
    w3 = init_conv1x1(k_w3, C3, Co3)
    out3 = jax.block_until_ready(jax.jit(dwt_pooling_alter_chan)(x3, w3))
    ref3 = _reference(x3, w3)
    assert out3.shape == (N3, Co3, H3 // 2, W3 // 2), out3.shape
    assert jnp.allclose(out3, ref3, rtol=1e-5, atol=1e-5), \
        float(jnp.max(jnp.abs(out3 - ref3)))

    print("KERNEL_OK")
</pallas_src>

<mosaic_0001>
module attributes {stable_mosaic.version = 11 : i64} {
  func.func @_dwt_alterchan_kernel(%arg0: i32, %arg1: memref<4x4x128xf32, #tpu.memory_space<vmem>>, %arg2: memref<8x4xf32, #tpu.memory_space<vmem>>, %arg3: memref<8x128xf32, #tpu.memory_space<vmem>>) attributes {dimension_semantics = [#tpu.dimension_semantics<parallel>], iteration_bounds = array<i64: 1>, scalar_prefetch = 0 : i64, scratch_operands = 0 : i64, tpu.core_type = #tpu.core_type<tc>, window_params = [{transform_indices = @transform_0, window_bounds = array<i64: 4, 4, 128>}, {pipeline_mode = #tpu.pipeline_mode<synchronous>, transform_indices = @transform_1, window_bounds = array<i64: 8, 4>}, {transform_indices = @transform_2, window_bounds = array<i64: 8, 128>}]} {
    %c0 = arith.constant 0 : index
    %c0_0 = arith.constant 0 : index
    %c0_1 = arith.constant 0 : index
    %0 = vector.load %arg1[%c0, %c0_0, %c0_1] : memref<4x4x128xf32, #tpu.memory_space<vmem>>, vector<1x4x128xf32>
    %1 = vector.shape_cast %0 : vector<1x4x128xf32> to vector<4x128xf32>
    %c1 = arith.constant 1 : index
    %c0_2 = arith.constant 0 : index
    %c0_3 = arith.constant 0 : index
    %2 = vector.load %arg1[%c1, %c0_2, %c0_3] : memref<4x4x128xf32, #tpu.memory_space<vmem>>, vector<1x4x128xf32>
    %3 = vector.shape_cast %2 : vector<1x4x128xf32> to vector<4x128xf32>
    %4 = arith.addf %1, %3 : vector<4x128xf32>
    %c2 = arith.constant 2 : index
    %c0_4 = arith.constant 0 : index
    %c0_5 = arith.constant 0 : index
    %5 = vector.load %arg1[%c2, %c0_4, %c0_5] : memref<4x4x128xf32, #tpu.memory_space<vmem>>, vector<1x4x128xf32>
    %6 = vector.shape_cast %5 : vector<1x4x128xf32> to vector<4x128xf32>
    %7 = arith.addf %4, %6 : vector<4x128xf32>
    %c3 = arith.constant 3 : index
    %c0_6 = arith.constant 0 : index
    %c0_7 = arith.constant 0 : index
    %8 = vector.load %arg1[%c3, %c0_6, %c0_7] : memref<4x4x128xf32, #tpu.memory_space<vmem>>, vector<1x4x128xf32>
    %9 = vector.shape_cast %8 : vector<1x4x128xf32> to vector<4x128xf32>
    %10 = arith.addf %7, %9 : vector<4x128xf32>
    %c0_8 = arith.constant 0 : index
    %c0_9 = arith.constant 0 : index
    %11 = vector.load %arg2[%c0_8, %c0_9] : memref<8x4xf32, #tpu.memory_space<vmem>>, vector<8x4xf32>
    %12 = vector.extract_strided_slice %11 {offsets = [0, 0], sizes = [8, 1], strides = [1, 1]} : vector<8x4xf32> to vector<8x1xf32>
    %13 = vector.extract_strided_slice %10 {offsets = [0, 0], sizes = [1, 128], strides = [1, 1]} : vector<4x128xf32> to vector<1x128xf32>
    %14 = vector.broadcast %12 : vector<8x1xf32> to vector<8x128xf32>
    %15 = vector.broadcast %13 : vector<1x128xf32> to vector<8x128xf32>
    %16 = arith.mulf %14, %15 : vector<8x128xf32>
    %17 = vector.extract_strided_slice %11 {offsets = [0, 1], sizes = [8, 1], strides = [1, 1]} : vector<8x4xf32> to vector<8x1xf32>
    %18 = vector.extract_strided_slice %10 {offsets = [1, 0], sizes = [1, 128], strides = [1, 1]} : vector<4x128xf32> to vector<1x128xf32>
    %19 = vector.broadcast %17 : vector<8x1xf32> to vector<8x128xf32>
    %20 = vector.broadcast %18 : vector<1x128xf32> to vector<8x128xf32>
    %21 = arith.mulf %19, %20 : vector<8x128xf32>
    %22 = arith.addf %16, %21 : vector<8x128xf32>
    %23 = vector.extract_strided_slice %11 {offsets = [0, 2], sizes = [8, 1], strides = [1, 1]} : vector<8x4xf32> to vector<8x1xf32>
    %24 = vector.extract_strided_slice %10 {offsets = [2, 0], sizes = [1, 128], strides = [1, 1]} : vector<4x128xf32> to vector<1x128xf32>
    %25 = vector.broadcast %23 : vector<8x1xf32> to vector<8x128xf32>
    %26 = vector.broadcast %24 : vector<1x128xf32> to vector<8x128xf32>
    %27 = arith.mulf %25, %26 : vector<8x128xf32>
    %28 = arith.addf %22, %27 : vector<8x128xf32>
    %29 = vector.extract_strided_slice %11 {offsets = [0, 3], sizes = [8, 1], strides = [1, 1]} : vector<8x4xf32> to vector<8x1xf32>
    %30 = vector.extract_strided_slice %10 {offsets = [3, 0], sizes = [1, 128], strides = [1, 1]} : vector<4x128xf32> to vector<1x128xf32>
    %31 = vector.broadcast %29 : vector<8x1xf32> to vector<8x128xf32>
    %32 = vector.broadcast %30 : vector<1x128xf32> to vector<8x128xf32>
    %33 = arith.mulf %31, %32 : vector<8x128xf32>
    %34 = arith.addf %28, %33 : vector<8x128xf32>
    %c0_10 = arith.constant 0 : index
    %c0_11 = arith.constant 0 : index
    %35 = vector.load %arg3[%c0_10, %c0_11] : memref<8x128xf32, #tpu.memory_space<vmem>>, vector<8x128xf32>
    tpu.vector_store %arg3[%c0_10, %c0_11], %34 {strides = array<i32>} : memref<8x128xf32, #tpu.memory_space<vmem>>, vector<8x128xf32>,
    return
  }
  func.func @transform_0(%arg0: i32) -> (i32, i32, i32) {
    %c0_i32 = arith.constant 0 : i32
    %c0_i32_0 = arith.constant 0 : i32
    %c0_i32_1 = arith.constant 0 : i32
    return %c0_i32, %c0_i32_0, %arg0 : i32, i32, i32
  }
  func.func @transform_1(%arg0: i32) -> (i32, i32) {
    %c0_i32 = arith.constant 0 : i32
    %c0_i32_0 = arith.constant 0 : i32
    %c0_i32_1 = arith.constant 0 : i32
    return %c0_i32, %c0_i32_0 : i32, i32
  }
  func.func @transform_2(%arg0: i32) -> (i32, i32) {
    %c0_i32 = arith.constant 0 : i32
    %c0_i32_0 = arith.constant 0 : i32
    return %c0_i32, %arg0 : i32, i32
  }
}

</mosaic_0001>

<bundles_post_ra>
// kernel: dwt_pooling_alter_chan.1
= control target key start
LH: loop header
LB: loop body
LE: loop exit
PB: predicated region body
PF: predicated region fallthrough
CT: control target
= control target key end

     0   :  { %v79_v0 = vmov 0   ;;  %v80_v2 = vmov 2   ;;  %v81_v3 = vmov 1   ;;  %v82_v4 = vmov 3   ;;  %s116_s1 = inlined_call_operand.vmem [shape: f32[8,4], index: 1, kind: input, shape index: {}]   ;;  %s117_s0 = inlined_call_operand.vmem [shape: f32[4,4,128], index: 0, kind: input, shape index: {}]   ;;  %s118_s2 = inlined_call_operand.vmem [shape: f32[8,128], index: 2, kind: output, shape index: {}]  }
   0x1   :  { %74 = vset.pattern.permute.xlu0 %v79_v0  ;;  %v21_v1 = vld [vmem:[%s116_s1] sm:$0xff]  ;;  %76 = vset.pattern.permute.xlu1 %v80_v2  ;;  %v27_v7 = vlaneseq  ;;  %v68_v9 = vld [vmem:[%s117_s0 + $0x8] sm:$0xf]  ;;  %v69_v12 = vld [vmem:[%s117_s0 + $0xc] sm:$0xf] }
   0x2   :  { %24 = vperm.xlu0 %74, %v21_v1   ;;  %43 = vperm.xlu1 %76, %v21_v1   ;;  %v11_v5 = vld [vmem:[%s117_s0] sm:$0xf]  ;;  %v67_v6 = vld [vmem:[%s117_s0 + $0x4] sm:$0xf] }
   0x3   :  { %v14_v8 = vadd.f32 %v67_v6, %v11_v5  ;;  %v28_v10 = vshrl.u32 %v27_v7, 7 }
   0x5   :  { %v17_v11 = vadd.f32 %v68_v9, %v14_v8  ;;  %v29_v13 = vsub.s32 0, %v28_v10  ;;  %v38_v15 = vsub.s32 1, %v28_v10  ;;  %v48_v17 = vsub.s32 2, %v28_v10 }
   0x6   :  { %75 = vset.pattern.permute.xlu0 %v81_v3  ;;  %77 = vset.pattern.permute.xlu1 %v82_v4  ;;  %v58_v19 = vsub.s32 3, %v28_v10 }
   0x7   :  { %33 = vperm.xlu0 %75, %v21_v1   ;;  %53 = vperm.xlu1 %77, %v21_v1   ;;  %v20_v14 = vadd.f32 %v69_v12, %v17_v11 }
   0x9   :  { %v30_v20 = vrot.slane %v20_v14, %v29_v13  ;;  %v39_v21 = vrot.slane %v20_v14, %v38_v15  ;;  %v49_v22 = vrot.slane %v20_v14, %v48_v17  ;;  %v59_v23 = vrot.slane %v20_v14, %v58_v19 }
   0xb   :  { %78 = vset.pattern.permute.xlu0 %v82_v4 }
  0x81   :  { %v25_v16 = vpop.permute.xlu0 %24  ;;  %v44_v18 = vpop.permute.xlu1 %43 }
  0x82   :  { %v31_v26 = vmul.f32 %v30_v20, %v25_v16  ;;  %v50_v28 = vmul.f32 %v49_v22, %v44_v18 }
  0x86   :  { %v34_v24 = vpop.permute.xlu0 %33  ;;  %v54_v25 = vpop.permute.xlu1 %53 }
  0x87   :  { %v40_v27 = vmul.f32 %v39_v21, %v34_v24  ;;  %v60_v30 = vmul.f32 %v59_v23, %v54_v25 }
  0x89   :  { %v41_v29 = vadd.f32 %v40_v27, %v31_v26 }
  0x8b   :  { %v51_v31 = vadd.f32 %v50_v28, %v41_v29 }
  0x8d   :  { %v61_v32 = vadd.f32 %v60_v30, %v51_v31 }
  0x8f   :  { %62 = vst [vmem:[%s118_s2] sm:$0xff] %v61_v32 }

</bundles_post_ra>
